<compile_context>
chip_gen: v7x
topology: tpu7x:2x2x1
jax: 0.10.0
libtpu: 0.0.40
codegen_flags: <defaults>
</compile_context>

<pallas_src>
import functools

import numpy as np
import jax
import jax.numpy as jnp
from jax import lax
from jax.experimental import pallas as pl
from jax.experimental.pallas import tpu as pltpu

LANE = 128


# ----------------------------------------------------------------------------
# Pallas kernel: per-tile partial sums for all SetCriterion losses
# ----------------------------------------------------------------------------
def set_criterion_kernel(logits_ref, tgt_cls_ref, boxes_ref, mask_flat_ref,
                         out_ref, *, num_classes, eos_coef):
    f32 = jnp.float32
    logits = logits_ref[...].astype(f32)            # (bb, Q, C1): cast in-kernel
    bb, Q, C1 = logits.shape

    tgt_c = tgt_cls_ref[...]                        # (bb, Q) int32
    matched = tgt_c != num_classes                  # "no-object" slots hold num_classes
    mask = matched.astype(f32)

    # ---------------- weighted cross entropy (no full log-softmax) ----------
    m = jnp.max(logits, axis=-1, keepdims=True)     # (bb, Q, 1)
    z = logits - m
    sumexp = jnp.sum(jnp.exp(z), axis=-1)           # (bb, Q)
    lse = jnp.log(sumexp)
    cls_iota = lax.broadcasted_iota(jnp.int32, (bb, Q, C1), 2)
    onehot = (cls_iota == tgt_c[:, :, None]).astype(f32)
    z_tgt = jnp.sum(z * onehot, axis=-1)            # shifted logit at target class
    nll = lse - z_tgt                               # (bb, Q)
    w = jnp.where(matched, 1.0, eos_coef)           # empty_weight[target]
    s_wnll = jnp.sum(w * nll)
    s_w = jnp.sum(w)

    # ---------------- class_error partials (matched queries only) -----------
    pred_cls = jnp.min(jnp.where(logits == m, cls_iota, C1), axis=-1)  # first-index argmax
    s_correct = jnp.sum((pred_cls == tgt_c).astype(f32) * mask)
    s_mask = jnp.sum(mask)

    # ---------------- cardinality partial (images never split across tiles) --
    non_empty = (pred_cls != num_classes).astype(f32)
    card_pred = jnp.sum(non_empty, axis=1, keepdims=True)   # (bb, 1)
    tgt_len = jnp.sum(mask, axis=1, keepdims=True)          # (bb, 1)
    s_card = jnp.sum(jnp.abs(card_pred - tgt_len))

    # ---------------- write lane-dense partial-sum block ---------------------
    lane = lax.broadcasted_iota(jnp.int32, (8, LANE), 1)
    sub = lax.broadcasted_iota(jnp.int32, (8, LANE), 0)
    vals = (jnp.where(lane == 0, s_wnll, 0.0) +
            jnp.where(lane == 1, s_w, 0.0) +
            jnp.where(lane == 2, s_correct, 0.0) +
            jnp.where(lane == 3, s_mask, 0.0) +
            jnp.where(lane == 4, s_card, 0.0))
    out_ref[...] = jnp.where(sub == 0, vals, 0.0).astype(out_ref.dtype)

    # ---------------- box L1 + GIoU: tiny resident slab, computed once -------
    @pl.when(pl.program_id(0) == 0)
    def _():
        mflat = mask_flat_ref[...]                  # (1, N)
        bx = boxes_ref[...]                         # (8, N): scx scy tcx tcy sw sh tw th
        s_bbox = jnp.sum((jnp.abs(bx[0:2] - bx[2:4]) +
                          jnp.abs(bx[4:6] - bx[6:8])) * mflat)

        xy0 = bx[0:4] - 0.5 * bx[4:8]               # rows: sx0 sy0 tx0 ty0
        xy1 = bx[0:4] + 0.5 * bx[4:8]               # rows: sx1 sy1 tx1 ty1
        area_s = bx[4:5] * bx[5:6]                  # sw * sh
        area_t = bx[6:7] * bx[7:8]                  # tw * th
        whi = jnp.maximum(jnp.minimum(xy1[0:2], xy1[2:4]) -
                          jnp.maximum(xy0[0:2], xy0[2:4]), 0.0)
        inter = whi[0:1] * whi[1:2]
        union = area_s + area_t - inter
        iou = inter / jnp.maximum(union, 1e-6)      # exact division (parity w/ reference)
        whc = (jnp.maximum(xy1[0:2], xy1[2:4]) -
               jnp.minimum(xy0[0:2], xy0[2:4]))
        area_c = jnp.maximum(whc[0:1] * whc[1:2], 1e-6)
        giou = iou - (area_c - union) / area_c
        s_giou = jnp.sum((1.0 - giou) * mflat)

        box_vals = (jnp.where(lane == 5, s_bbox, 0.0) +
                    jnp.where(lane == 6, s_giou, 0.0))
        out_ref[...] = out_ref[...] + jnp.where(sub == 0, box_vals, 0.0)


# ----------------------------------------------------------------------------
# Wrapper: batch-tiled grid + trivial final normalisations in XLA
# ----------------------------------------------------------------------------
def _pad_to(n, mult):
    return max(mult, ((n + mult - 1) // mult) * mult)


def _choose_tile_b(B, Q, C1, itemsize):
    # Largest batch tile that (a) divides B, (b) is a multiple of 8 (second-minor
    # tiling rule for the (bb, Q) target block) unless it is the full batch, and
    # (c) keeps the double-buffered logits block well inside the default scoped
    # VMEM budget on every TPU generation (incl. v7x's 64 MiB VMEM).
    budget = 4 << 20
    if B * Q * C1 * itemsize <= budget:
        return B
    cands = [d for d in range(8, B + 1, 8)
             if B % d == 0 and d * Q * C1 * itemsize <= budget]
    return max(cands) if cands else B


@functools.partial(jax.jit, static_argnames=("eos_coef", "tile_b"))
def set_criterion_losses(logits, pred_boxes, target_classes, tgt_boxes_full,
                         num_boxes, *, eos_coef, tile_b=None):
    B, Q, C1 = logits.shape
    num_classes = C1 - 1
    N = B * Q
    N_pad = _pad_to(N, LANE)

    if tile_b is None:
        bb = _choose_tile_b(B, Q, C1, jnp.dtype(logits.dtype).itemsize)
    else:
        bb = int(tile_b)
        if B % bb != 0 or (bb != B and bb % 8 != 0):
            raise ValueError("tile_b must divide B and be a multiple of 8 (or == B)")
    n_tiles = B // bb

    target_classes = target_classes.astype(jnp.int32)

    # Box slab (layout plumbing only, tiny): queries on lanes, rows =
    # [scx, scy, tcx, tcy, sw, sh, tw, th] so corners are two (4, N) ops in-kernel.
    sb = jnp.transpose(jnp.reshape(pred_boxes.astype(jnp.float32), (N, 4)))      # (4, N)
    tb = jnp.transpose(jnp.reshape(tgt_boxes_full.astype(jnp.float32), (N, 4)))  # (4, N)
    boxes = jnp.concatenate([sb[0:2], tb[0:2], sb[2:4], tb[2:4]], axis=0)
    boxes = jnp.pad(boxes, ((0, 0), (0, N_pad - N)))                             # (8, N_pad)

    mask_flat = (target_classes != num_classes).astype(jnp.float32)
    mask_flat = jnp.pad(jnp.reshape(mask_flat, (1, N)), ((0, 0), (0, N_pad - N)))

    kernel = functools.partial(set_criterion_kernel,
                               num_classes=num_classes, eos_coef=float(eos_coef))

    partials = pl.pallas_call(
        kernel,
        out_shape=jax.ShapeDtypeStruct((n_tiles * 8, LANE), jnp.float32),
        grid=(n_tiles,),
        in_specs=[
            pl.BlockSpec((bb, Q, C1), lambda i: (i, 0, 0)),   # logits tile (pipelined)
            pl.BlockSpec((bb, Q), lambda i: (i, 0)),          # target classes tile
            pl.BlockSpec((8, N_pad), lambda i: (0, 0)),       # box slab, resident
            pl.BlockSpec((1, N_pad), lambda i: (0, 0)),       # matched mask, resident
        ],
        out_specs=pl.BlockSpec((8, LANE), lambda i: (i, 0)),  # per-tile partial sums
        compiler_params=pltpu.CompilerParams(
            dimension_semantics=("parallel",)),
    )(logits, target_classes, boxes, mask_flat)

    totals = jnp.sum(partials, axis=0)                         # (128,)
    nb = jnp.maximum(jnp.asarray(num_boxes, jnp.float32), 1.0)
    # TODO(synk): reference all-reduces num_boxes across data-parallel workers here.
    loss_ce = totals[0] / totals[1]
    class_error = 100.0 - 100.0 * totals[2] / jnp.maximum(totals[3], 1.0)
    cardinality_error = totals[4] / B
    loss_bbox = totals[5] / nb
    loss_giou = totals[6] / nb
    return {
        "loss_ce": loss_ce,
        "class_error": class_error,
        "cardinality_error": cardinality_error,
        "loss_bbox": loss_bbox,
        "loss_giou": loss_giou,
    }


# ----------------------------------------------------------------------------
# Host-side glue: deterministic greedy matcher (replaces Hungarian assignment)
# ----------------------------------------------------------------------------
def greedy_matcher(logits, pred_boxes, labels_list, boxes_list):
    probs = np.asarray(jax.nn.softmax(logits.astype(jnp.float32), axis=-1))
    pboxes = np.asarray(pred_boxes)
    indices = []
    for b in range(len(labels_list)):
        labels = np.asarray(labels_list[b])
        boxes = np.asarray(boxes_list[b])
        if labels.shape[0] == 0:
            indices.append((np.zeros(0, np.int32), np.zeros(0, np.int32)))
            continue
        cost_class = -probs[b][:, labels]                                    # (Q, T)
        cost_bbox = np.abs(pboxes[b][:, None, :] - boxes[None, :, :]).sum(-1)
        C = cost_class + 5.0 * cost_bbox
        src, tgt, used = [], [], set()
        for j in range(labels.shape[0]):
            for q in np.argsort(C[:, j]):
                if int(q) not in used:
                    used.add(int(q))
                    src.append(int(q))
                    tgt.append(j)
                    break
        indices.append((np.asarray(src, np.int32), np.asarray(tgt, np.int32)))
    return indices


# ----------------------------------------------------------------------------
# NumPy reference (uses the same matching) for a numerical sanity check
# ----------------------------------------------------------------------------
def reference_losses_np(logits, pred_boxes, target_classes, tgt_boxes_full,
                        eos_coef, num_boxes):
    logits = np.asarray(logits, dtype=np.float64)
    B, Q, C1 = logits.shape
    nc = C1 - 1
    tgt = np.asarray(target_classes)
    matched = tgt != nc

    m = logits.max(-1, keepdims=True)
    z = logits - m
    lse = np.log(np.exp(z).sum(-1, keepdims=True))
    logp = z - lse
    nll = -np.take_along_axis(logp, tgt[..., None], axis=-1)[..., 0]
    w = np.where(matched, 1.0, eos_coef)
    loss_ce = (w * nll).sum() / w.sum()

    pred = logits.argmax(-1)
    if matched.sum() > 0:
        acc = (pred[matched] == tgt[matched]).mean() * 100.0
    else:
        acc = 0.0
    class_error = 100.0 - acc

    card_pred = (pred != nc).sum(-1)
    tgt_len = matched.sum(-1)
    card_err = np.abs(card_pred - tgt_len).astype(np.float64).mean()

    nb = max(float(num_boxes), 1.0)
    sb = np.asarray(pred_boxes, np.float64)[matched]
    tb = np.asarray(tgt_boxes_full, np.float64)[matched]
    loss_bbox = np.abs(sb - tb).sum() / nb

    def to_xyxy(b):
        return np.stack([b[:, 0] - 0.5 * b[:, 2], b[:, 1] - 0.5 * b[:, 3],
                         b[:, 0] + 0.5 * b[:, 2], b[:, 1] + 0.5 * b[:, 3]], -1)

    sx, tx = to_xyxy(sb), to_xyxy(tb)
    area_s = (sx[:, 2] - sx[:, 0]) * (sx[:, 3] - sx[:, 1])
    area_t = (tx[:, 2] - tx[:, 0]) * (tx[:, 3] - tx[:, 1])
    wh = np.clip(np.minimum(sx[:, 2:], tx[:, 2:]) - np.maximum(sx[:, :2], tx[:, :2]), 0, None)
    inter = wh[:, 0] * wh[:, 1]
    union = area_s + area_t - inter
    iou = inter / union if union.size else inter
    whc = np.maximum(sx[:, 2:], tx[:, 2:]) - np.minimum(sx[:, :2], tx[:, :2])
    area_c = whc[:, 0] * whc[:, 1]
    giou = iou - (area_c - union) / area_c if union.size else iou
    loss_giou = (1.0 - giou).sum() / nb

    return {"loss_ce": loss_ce, "class_error": class_error,
            "cardinality_error": card_err, "loss_bbox": loss_bbox,
            "loss_giou": loss_giou}


if __name__ == "__main__":
    num_classes = 4          # pred_logits has num_classes + 1 = 5 channels
    eos_coef = 0.1
    B, Q, C1 = 16, 8, num_classes + 1

    key = jax.random.PRNGKey(0)
    k1, k2, k3, k4, k5 = jax.random.split(key, 5)

    # synthetic DETR head outputs; bf16 logits exercise the half-width HBM transport
    logits = jax.random.normal(k1, (B, Q, C1), dtype=jnp.float32).astype(jnp.bfloat16)
    pred_boxes = jax.nn.sigmoid(jax.random.normal(k2, (B, Q, 4), dtype=jnp.float32))

    # synthetic targets: 0..3 boxes per image
    n_tgt = [int(v) for v in np.asarray(jax.random.randint(k5, (B,), 0, 4))]
    labels_list, boxes_list = [], []
    for b, n in enumerate(n_tgt):
        kl = jax.random.fold_in(k3, b)
        kb = jax.random.fold_in(k4, b)
        labels_list.append(np.asarray(
            jax.random.randint(kl, (n,), 0, num_classes), dtype=np.int32))
        cxcy = np.asarray(jax.random.uniform(kb, (n, 2), minval=0.25, maxval=0.75))
        wh = np.asarray(jax.random.uniform(jax.random.fold_in(kb, 1), (n, 2),
                                           minval=0.1, maxval=0.3))
        boxes_list.append(np.concatenate([cxcy, wh], axis=1).astype(np.float32))

    indices = greedy_matcher(logits, pred_boxes, labels_list, boxes_list)

    # scatter matched targets onto the [B, Q] query grid (unmatched == num_classes)
    target_classes = np.full((B, Q), num_classes, dtype=np.int32)
    tgt_boxes_full = np.zeros((B, Q, 4), dtype=np.float32)
    for b, (src, tgt) in enumerate(indices):
        if len(src):
            target_classes[b, src] = labels_list[b][tgt]
            tgt_boxes_full[b, src] = boxes_list[b][tgt]

    num_boxes = float(sum(n_tgt))

    losses = set_criterion_losses(
        logits, pred_boxes, jnp.asarray(target_classes), jnp.asarray(tgt_boxes_full),
        num_boxes, eos_coef=eos_coef, tile_b=8)      # tile_b=8 -> 2-step "parallel" grid
    jax.block_until_ready(losses)

    ref = reference_losses_np(np.asarray(logits.astype(jnp.float32)),
                              np.asarray(pred_boxes), target_classes, tgt_boxes_full,
                              eos_coef, num_boxes)
    for k, v in ref.items():
        np.testing.assert_allclose(float(losses[k]), v, rtol=2e-3, atol=2e-3, err_msg=k)

    print("KERNEL_OK")
</pallas_src>

<mosaic_0001>
module attributes {stable_mosaic.version = 11 : i64} {
  func.func @set_criterion_kernel(%arg0: i32, %arg1: memref<8x8x5xbf16, #tpu.memory_space<vmem>>, %arg2: memref<8x8xi32, #tpu.memory_space<vmem>>, %arg3: memref<8x128xf32, #tpu.memory_space<vmem>>, %arg4: memref<1x128xf32, #tpu.memory_space<vmem>>, %arg5: memref<8x128xf32, #tpu.memory_space<vmem>>) attributes {dimension_semantics = [#tpu.dimension_semantics<parallel>], iteration_bounds = array<i64: 2>, scalar_prefetch = 0 : i64, scratch_operands = 0 : i64, tpu.core_type = #tpu.core_type<tc>, window_params = [{transform_indices = @transform_0, window_bounds = array<i64: 8, 8, 5>}, {transform_indices = @transform_1, window_bounds = array<i64: 8, 8>}, {pipeline_mode = #tpu.pipeline_mode<synchronous>, transform_indices = @transform_2, window_bounds = array<i64: 8, 128>}, {pipeline_mode = #tpu.pipeline_mode<synchronous>, transform_indices = @transform_3, window_bounds = array<i64: 1, 128>}, {transform_indices = @transform_4, window_bounds = array<i64: 8, 128>}]} {
    %c0 = arith.constant 0 : index
    %c0_0 = arith.constant 0 : index
    %c0_1 = arith.constant 0 : index
    %0 = vector.load %arg1[%c0, %c0_0, %c0_1] : memref<8x8x5xbf16, #tpu.memory_space<vmem>>, vector<8x8x5xbf16>
    %1 = arith.extf %0 : vector<8x8x5xbf16> to vector<8x8x5xf32>
    %c0_2 = arith.constant 0 : index
    %c0_3 = arith.constant 0 : index
    %2 = vector.load %arg2[%c0_2, %c0_3] : memref<8x8xi32, #tpu.memory_space<vmem>>, vector<8x8xi32>
    %c4_i32 = arith.constant 4 : i32
    %3 = vector.broadcast %c4_i32 : i32 to vector<8x8xi32>
    %4 = arith.cmpi ne, %2, %3 : vector<8x8xi32>
    %5 = arith.extui %4 : vector<8x8xi1> to vector<8x8xi32>
    %6 = arith.sitofp %5 : vector<8x8xi32> to vector<8x8xf32>
    %cst = arith.constant dense<0xFF800000> : vector<8x8xf32>
    %7 = vector.multi_reduction <maximumf>, %1, %cst [2] : vector<8x8x5xf32> to vector<8x8xf32>
    %8 = vector.shape_cast %7 : vector<8x8xf32> to vector<8x8x1xf32>
    %9 = vector.broadcast %8 : vector<8x8x1xf32> to vector<8x8x5xf32>
    %10 = arith.subf %1, %9 : vector<8x8x5xf32>
    %11 = math.exp %10 : vector<8x8x5xf32>
    %cst_4 = arith.constant dense<0.000000e+00> : vector<8x8xf32>
    %12 = vector.multi_reduction <add>, %11, %cst_4 [2] : vector<8x8x5xf32> to vector<8x8xf32>
    %13 = math.log %12 : vector<8x8xf32>
    %14 = tpu.iota {dimensions = array<i32: 2>} : vector<8x8x5xi32>
    %15 = vector.shape_cast %2 : vector<8x8xi32> to vector<8x8x1xi32>
    %16 = vector.broadcast %15 : vector<8x8x1xi32> to vector<8x8x5xi32>
    %17 = arith.cmpi eq, %14, %16 : vector<8x8x5xi32>
    %18 = arith.extui %17 : vector<8x8x5xi1> to vector<8x8x5xi32>
    %19 = arith.sitofp %18 : vector<8x8x5xi32> to vector<8x8x5xf32>
    %20 = arith.mulf %10, %19 : vector<8x8x5xf32>
    %cst_5 = arith.constant dense<0.000000e+00> : vector<8x8xf32>
    %21 = vector.multi_reduction <add>, %20, %cst_5 [2] : vector<8x8x5xf32> to vector<8x8xf32>
    %22 = arith.subf %13, %21 : vector<8x8xf32>
    %cst_6 = arith.constant 1.000000e+00 : f32
    %cst_7 = arith.constant 1.000000e-01 : f32
    %23 = vector.broadcast %cst_6 : f32 to vector<8x8xf32>
    %24 = vector.broadcast %cst_7 : f32 to vector<8x8xf32>
    %25 = arith.select %4, %23, %24 : vector<8x8xi1>, vector<8x8xf32>
    %26 = arith.mulf %25, %22 : vector<8x8xf32>
    %27 = vector.shape_cast %26 : vector<8x8xf32> to vector<1x8x8xf32>
    %cst_8 = arith.constant dense<0.000000e+00> : vector<1xf32>
    %28 = vector.multi_reduction <add>, %27, %cst_8 [1, 2] : vector<1x8x8xf32> to vector<1xf32>
    %29 = vector.shape_cast %28 : vector<1xf32> to vector<1x1x1xf32>
    %30 = vector.extract %29[0, 0, 0] : f32 from vector<1x1x1xf32>
    %31 = vector.shape_cast %25 : vector<8x8xf32> to vector<1x8x8xf32>
    %cst_9 = arith.constant dense<0.000000e+00> : vector<1xf32>
    %32 = vector.multi_reduction <add>, %31, %cst_9 [1, 2] : vector<1x8x8xf32> to vector<1xf32>
    %33 = vector.shape_cast %32 : vector<1xf32> to vector<1x1x1xf32>
    %34 = vector.extract %33[0, 0, 0] : f32 from vector<1x1x1xf32>
    %35 = vector.broadcast %8 : vector<8x8x1xf32> to vector<8x8x5xf32>
    %36 = arith.cmpf oeq, %1, %35 : vector<8x8x5xf32>
    %c5_i32 = arith.constant 5 : i32
    %37 = vector.broadcast %c5_i32 : i32 to vector<8x8x5xi32>
    %38 = arith.select %36, %14, %37 : vector<8x8x5xi1>, vector<8x8x5xi32>
    %cst_10 = arith.constant dense<2147483647> : vector<8x8xi32>
    %39 = vector.multi_reduction <minsi>, %38, %cst_10 [2] : vector<8x8x5xi32> to vector<8x8xi32>
    %40 = arith.cmpi eq, %39, %2 : vector<8x8xi32>
    %41 = arith.extui %40 : vector<8x8xi1> to vector<8x8xi32>
    %42 = arith.sitofp %41 : vector<8x8xi32> to vector<8x8xf32>
    %43 = arith.mulf %42, %6 : vector<8x8xf32>
    %44 = vector.shape_cast %43 : vector<8x8xf32> to vector<1x8x8xf32>
    %cst_11 = arith.constant dense<0.000000e+00> : vector<1xf32>
    %45 = vector.multi_reduction <add>, %44, %cst_11 [1, 2] : vector<1x8x8xf32> to vector<1xf32>
    %46 = vector.shape_cast %45 : vector<1xf32> to vector<1x1x1xf32>
    %47 = vector.extract %46[0, 0, 0] : f32 from vector<1x1x1xf32>
    %48 = vector.shape_cast %6 : vector<8x8xf32> to vector<1x8x8xf32>
    %cst_12 = arith.constant dense<0.000000e+00> : vector<1xf32>
    %49 = vector.multi_reduction <add>, %48, %cst_12 [1, 2] : vector<1x8x8xf32> to vector<1xf32>
    %50 = vector.shape_cast %49 : vector<1xf32> to vector<1x1x1xf32>
    %51 = vector.extract %50[0, 0, 0] : f32 from vector<1x1x1xf32>
    %c4_i32_13 = arith.constant 4 : i32
    %52 = vector.broadcast %c4_i32_13 : i32 to vector<8x8xi32>
    %53 = arith.cmpi ne, %39, %52 : vector<8x8xi32>
    %54 = arith.extui %53 : vector<8x8xi1> to vector<8x8xi32>
    %55 = arith.sitofp %54 : vector<8x8xi32> to vector<8x8xf32>
    %cst_14 = arith.constant dense<0.000000e+00> : vector<8xf32>
    %56 = vector.multi_reduction <add>, %55, %cst_14 [1] : vector<8x8xf32> to vector<8xf32>
    %57 = vector.shape_cast %56 : vector<8xf32> to vector<8x1xf32>
    %cst_15 = arith.constant dense<0.000000e+00> : vector<8xf32>
    %58 = vector.multi_reduction <add>, %6, %cst_15 [1] : vector<8x8xf32> to vector<8xf32>
    %59 = vector.shape_cast %58 : vector<8xf32> to vector<8x1xf32>
    %60 = arith.subf %57, %59 : vector<8x1xf32>
    %61 = math.absf %60 : vector<8x1xf32>
    %62 = vector.shape_cast %61 : vector<8x1xf32> to vector<1x8x1xf32>
    %cst_16 = arith.constant dense<0.000000e+00> : vector<1xf32>
    %63 = vector.multi_reduction <add>, %62, %cst_16 [1, 2] : vector<1x8x1xf32> to vector<1xf32>
    %64 = vector.shape_cast %63 : vector<1xf32> to vector<1x1x1xf32>
    %65 = vector.extract %64[0, 0, 0] : f32 from vector<1x1x1xf32>
    %66 = tpu.iota {dimensions = array<i32: 1>} : vector<8x128xi32>
    %67 = tpu.iota {dimensions = array<i32: 0>} : vector<8x128xi32>
    %c0_i32 = arith.constant 0 : i32
    %68 = vector.broadcast %c0_i32 : i32 to vector<8x128xi32>
    %69 = arith.cmpi eq, %66, %68 : vector<8x128xi32>
    %cst_17 = arith.constant 0.000000e+00 : f32
    %70 = vector.broadcast %30 : f32 to vector<8x128xf32>
    %71 = vector.broadcast %cst_17 : f32 to vector<8x128xf32>
    %72 = arith.select %69, %70, %71 : vector<8x128xi1>, vector<8x128xf32>
    %c1_i32 = arith.constant 1 : i32
    %73 = vector.broadcast %c1_i32 : i32 to vector<8x128xi32>
    %74 = arith.cmpi eq, %66, %73 : vector<8x128xi32>
    %cst_18 = arith.constant 0.000000e+00 : f32
    %75 = vector.broadcast %34 : f32 to vector<8x128xf32>
    %76 = vector.broadcast %cst_18 : f32 to vector<8x128xf32>
    %77 = arith.select %74, %75, %76 : vector<8x128xi1>, vector<8x128xf32>
    %78 = arith.addf %72, %77 : vector<8x128xf32>
    %c2_i32 = arith.constant 2 : i32
    %79 = vector.broadcast %c2_i32 : i32 to vector<8x128xi32>
    %80 = arith.cmpi eq, %66, %79 : vector<8x128xi32>
    %cst_19 = arith.constant 0.000000e+00 : f32
    %81 = vector.broadcast %47 : f32 to vector<8x128xf32>
    %82 = vector.broadcast %cst_19 : f32 to vector<8x128xf32>
    %83 = arith.select %80, %81, %82 : vector<8x128xi1>, vector<8x128xf32>
    %84 = arith.addf %78, %83 : vector<8x128xf32>
    %c3_i32 = arith.constant 3 : i32
    %85 = vector.broadcast %c3_i32 : i32 to vector<8x128xi32>
    %86 = arith.cmpi eq, %66, %85 : vector<8x128xi32>
    %cst_20 = arith.constant 0.000000e+00 : f32
    %87 = vector.broadcast %51 : f32 to vector<8x128xf32>
    %88 = vector.broadcast %cst_20 : f32 to vector<8x128xf32>
    %89 = arith.select %86, %87, %88 : vector<8x128xi1>, vector<8x128xf32>
    %90 = arith.addf %84, %89 : vector<8x128xf32>
    %c4_i32_21 = arith.constant 4 : i32
    %91 = vector.broadcast %c4_i32_21 : i32 to vector<8x128xi32>
    %92 = arith.cmpi eq, %66, %91 : vector<8x128xi32>
    %cst_22 = arith.constant 0.000000e+00 : f32
    %93 = vector.broadcast %65 : f32 to vector<8x128xf32>
    %94 = vector.broadcast %cst_22 : f32 to vector<8x128xf32>
    %95 = arith.select %92, %93, %94 : vector<8x128xi1>, vector<8x128xf32>
    %96 = arith.addf %90, %95 : vector<8x128xf32>
    %c0_i32_23 = arith.constant 0 : i32
    %97 = vector.broadcast %c0_i32_23 : i32 to vector<8x128xi32>
    %98 = arith.cmpi eq, %67, %97 : vector<8x128xi32>
    %cst_24 = arith.constant 0.000000e+00 : f32
    %99 = vector.broadcast %cst_24 : f32 to vector<8x128xf32>
    %100 = arith.select %98, %96, %99 : vector<8x128xi1>, vector<8x128xf32>
    %c0_25 = arith.constant 0 : index
    %c0_26 = arith.constant 0 : index
    %101 = vector.load %arg5[%c0_25, %c0_26] : memref<8x128xf32, #tpu.memory_space<vmem>>, vector<8x128xf32>
    tpu.vector_store %arg5[%c0_25, %c0_26], %100 {strides = array<i32>} : memref<8x128xf32, #tpu.memory_space<vmem>>, vector<8x128xf32>,
    %c0_i32_27 = arith.constant 0 : i32
    %102 = arith.cmpi eq, %arg0, %c0_i32_27 : i32
    %103 = arith.extui %102 : i1 to i32
    %c0_i32_28 = arith.constant 0 : i32
    %104 = arith.cmpi ne, %103, %c0_i32_28 : i32
    scf.if %104 {
      %c0_29 = arith.constant 0 : index
      %c0_30 = arith.constant 0 : index
      %105 = vector.load %arg4[%c0_29, %c0_30] : memref<1x128xf32, #tpu.memory_space<vmem>>, vector<1x128xf32>
      %c0_31 = arith.constant 0 : index
      %c0_32 = arith.constant 0 : index
      %106 = vector.load %arg3[%c0_31, %c0_32] : memref<8x128xf32, #tpu.memory_space<vmem>>, vector<8x128xf32>
      %107 = vector.extract_strided_slice %106 {offsets = [0, 0], sizes = [2, 128], strides = [1, 1]} : vector<8x128xf32> to vector<2x128xf32>
      %108 = vector.extract_strided_slice %106 {offsets = [2, 0], sizes = [2, 128], strides = [1, 1]} : vector<8x128xf32> to vector<2x128xf32>
      %109 = arith.subf %107, %108 : vector<2x128xf32>
      %110 = math.absf %109 : vector<2x128xf32>
      %111 = vector.extract_strided_slice %106 {offsets = [4, 0], sizes = [2, 128], strides = [1, 1]} : vector<8x128xf32> to vector<2x128xf32>
      %112 = vector.extract_strided_slice %106 {offsets = [6, 0], sizes = [2, 128], strides = [1, 1]} : vector<8x128xf32> to vector<2x128xf32>
      %113 = arith.subf %111, %112 : vector<2x128xf32>
      %114 = math.absf %113 : vector<2x128xf32>
      %115 = arith.addf %110, %114 : vector<2x128xf32>
      %116 = vector.broadcast %105 : vector<1x128xf32> to vector<2x128xf32>
      %117 = arith.mulf %115, %116 : vector<2x128xf32>
      %118 = vector.shape_cast %117 : vector<2x128xf32> to vector<1x2x128xf32>
      %cst_33 = arith.constant dense<0.000000e+00> : vector<1xf32>
      %119 = vector.multi_reduction <add>, %118, %cst_33 [1, 2] : vector<1x2x128xf32> to vector<1xf32>
      %120 = vector.shape_cast %119 : vector<1xf32> to vector<1x1x1xf32>
      %121 = vector.extract %120[0, 0, 0] : f32 from vector<1x1x1xf32>
      %122 = vector.extract_strided_slice %106 {offsets = [0, 0], sizes = [4, 128], strides = [1, 1]} : vector<8x128xf32> to vector<4x128xf32>
      %123 = vector.extract_strided_slice %106 {offsets = [4, 0], sizes = [4, 128], strides = [1, 1]} : vector<8x128xf32> to vector<4x128xf32>
      %cst_34 = arith.constant 5.000000e-01 : f32
      %124 = vector.broadcast %cst_34 : f32 to vector<4x128xf32>
      %125 = arith.mulf %124, %123 : vector<4x128xf32>
      %126 = arith.subf %122, %125 : vector<4x128xf32>
      %127 = vector.extract_strided_slice %106 {offsets = [0, 0], sizes = [4, 128], strides = [1, 1]} : vector<8x128xf32> to vector<4x128xf32>
      %128 = vector.extract_strided_slice %106 {offsets = [4, 0], sizes = [4, 128], strides = [1, 1]} : vector<8x128xf32> to vector<4x128xf32>
      %cst_35 = arith.constant 5.000000e-01 : f32
      %129 = vector.broadcast %cst_35 : f32 to vector<4x128xf32>
      %130 = arith.mulf %129, %128 : vector<4x128xf32>
      %131 = arith.addf %127, %130 : vector<4x128xf32>
      %132 = vector.extract_strided_slice %106 {offsets = [4, 0], sizes = [1, 128], strides = [1, 1]} : vector<8x128xf32> to vector<1x128xf32>
      %133 = vector.extract_strided_slice %106 {offsets = [5, 0], sizes = [1, 128], strides = [1, 1]} : vector<8x128xf32> to vector<1x128xf32>
      %134 = arith.mulf %132, %133 : vector<1x128xf32>
      %135 = vector.extract_strided_slice %106 {offsets = [6, 0], sizes = [1, 128], strides = [1, 1]} : vector<8x128xf32> to vector<1x128xf32>
      %136 = vector.extract_strided_slice %106 {offsets = [7, 0], sizes = [1, 128], strides = [1, 1]} : vector<8x128xf32> to vector<1x128xf32>
      %137 = arith.mulf %135, %136 : vector<1x128xf32>
      %138 = vector.extract_strided_slice %131 {offsets = [0, 0], sizes = [2, 128], strides = [1, 1]} : vector<4x128xf32> to vector<2x128xf32>
      %139 = vector.extract_strided_slice %131 {offsets = [2, 0], sizes = [2, 128], strides = [1, 1]} : vector<4x128xf32> to vector<2x128xf32>
      %140 = arith.minimumf %138, %139 : vector<2x128xf32>
      %141 = vector.extract_strided_slice %126 {offsets = [0, 0], sizes = [2, 128], strides = [1, 1]} : vector<4x128xf32> to vector<2x128xf32>
      %142 = vector.extract_strided_slice %126 {offsets = [2, 0], sizes = [2, 128], strides = [1, 1]} : vector<4x128xf32> to vector<2x128xf32>
      %143 = arith.maximumf %141, %142 : vector<2x128xf32>
      %144 = arith.subf %140, %143 : vector<2x128xf32>
      %cst_36 = arith.constant 0.000000e+00 : f32
      %145 = vector.broadcast %cst_36 : f32 to vector<2x128xf32>
      %146 = arith.maximumf %144, %145 : vector<2x128xf32>
      %147 = vector.extract_strided_slice %146 {offsets = [0, 0], sizes = [1, 128], strides = [1, 1]} : vector<2x128xf32> to vector<1x128xf32>
      %148 = vector.extract_strided_slice %146 {offsets = [1, 0], sizes = [1, 128], strides = [1, 1]} : vector<2x128xf32> to vector<1x128xf32>
      %149 = arith.mulf %147, %148 : vector<1x128xf32>
      %150 = arith.addf %134, %137 : vector<1x128xf32>
      %151 = arith.subf %150, %149 : vector<1x128xf32>
      %cst_37 = arith.constant 9.99999997E-7 : f32
      %152 = vector.broadcast %cst_37 : f32 to vector<1x128xf32>
      %153 = arith.maximumf %151, %152 : vector<1x128xf32>
      %154 = arith.divf %149, %153 : vector<1x128xf32>
      %155 = vector.extract_strided_slice %131 {offsets = [0, 0], sizes = [2, 128], strides = [1, 1]} : vector<4x128xf32> to vector<2x128xf32>
      %156 = vector.extract_strided_slice %131 {offsets = [2, 0], sizes = [2, 128], strides = [1, 1]} : vector<4x128xf32> to vector<2x128xf32>
      %157 = arith.maximumf %155, %156 : vector<2x128xf32>
      %158 = vector.extract_strided_slice %126 {offsets = [0, 0], sizes = [2, 128], strides = [1, 1]} : vector<4x128xf32> to vector<2x128xf32>
      %159 = vector.extract_strided_slice %126 {offsets = [2, 0], sizes = [2, 128], strides = [1, 1]} : vector<4x128xf32> to vector<2x128xf32>
      %160 = arith.minimumf %158, %159 : vector<2x128xf32>
      %161 = arith.subf %157, %160 : vector<2x128xf32>
      %162 = vector.extract_strided_slice %161 {offsets = [0, 0], sizes = [1, 128], strides = [1, 1]} : vector<2x128xf32> to vector<1x128xf32>
      %163 = vector.extract_strided_slice %161 {offsets = [1, 0], sizes = [1, 128], strides = [1, 1]} : vector<2x128xf32> to vector<1x128xf32>
      %164 = arith.mulf %162, %163 : vector<1x128xf32>
      %cst_38 = arith.constant 9.99999997E-7 : f32
      %165 = vector.broadcast %cst_38 : f32 to vector<1x128xf32>
      %166 = arith.maximumf %164, %165 : vector<1x128xf32>
      %167 = arith.subf %166, %151 : vector<1x128xf32>
      %168 = arith.divf %167, %166 : vector<1x128xf32>
      %169 = arith.subf %154, %168 : vector<1x128xf32>
      %cst_39 = arith.constant 1.000000e+00 : f32
      %170 = vector.broadcast %cst_39 : f32 to vector<1x128xf32>
      %171 = arith.subf %170, %169 : vector<1x128xf32>
      %172 = arith.mulf %171, %105 : vector<1x128xf32>
      %173 = vector.shape_cast %172 : vector<1x128xf32> to vector<1x1x128xf32>
      %cst_40 = arith.constant dense<0.000000e+00> : vector<1xf32>
      %174 = vector.multi_reduction <add>, %173, %cst_40 [1, 2] : vector<1x1x128xf32> to vector<1xf32>
      %175 = vector.shape_cast %174 : vector<1xf32> to vector<1x1x1xf32>
      %176 = vector.extract %175[0, 0, 0] : f32 from vector<1x1x1xf32>
      %c5_i32_41 = arith.constant 5 : i32
      %177 = vector.broadcast %c5_i32_41 : i32 to vector<8x128xi32>
      %178 = arith.cmpi eq, %66, %177 : vector<8x128xi32>
      %cst_42 = arith.constant 0.000000e+00 : f32
      %179 = vector.broadcast %121 : f32 to vector<8x128xf32>
      %180 = vector.broadcast %cst_42 : f32 to vector<8x128xf32>
      %181 = arith.select %178, %179, %180 : vector<8x128xi1>, vector<8x128xf32>
      %c6_i32 = arith.constant 6 : i32
      %182 = vector.broadcast %c6_i32 : i32 to vector<8x128xi32>
      %183 = arith.cmpi eq, %66, %182 : vector<8x128xi32>
      %cst_43 = arith.constant 0.000000e+00 : f32
      %184 = vector.broadcast %176 : f32 to vector<8x128xf32>
      %185 = vector.broadcast %cst_43 : f32 to vector<8x128xf32>
      %186 = arith.select %183, %184, %185 : vector<8x128xi1>, vector<8x128xf32>
      %187 = arith.addf %181, %186 : vector<8x128xf32>
      %c0_44 = arith.constant 0 : index
      %c0_45 = arith.constant 0 : index
      %188 = vector.load %arg5[%c0_44, %c0_45] : memref<8x128xf32, #tpu.memory_space<vmem>>, vector<8x128xf32>
      %c0_i32_46 = arith.constant 0 : i32
      %189 = vector.broadcast %c0_i32_46 : i32 to vector<8x128xi32>
      %190 = arith.cmpi eq, %67, %189 : vector<8x128xi32>
      %cst_47 = arith.constant 0.000000e+00 : f32
      %191 = vector.broadcast %cst_47 : f32 to vector<8x128xf32>
      %192 = arith.select %190, %187, %191 : vector<8x128xi1>, vector<8x128xf32>
      %193 = arith.addf %188, %192 : vector<8x128xf32>
      %c0_48 = arith.constant 0 : index
      %c0_49 = arith.constant 0 : index
      %194 = vector.load %arg5[%c0_48, %c0_49] : memref<8x128xf32, #tpu.memory_space<vmem>>, vector<8x128xf32>
      tpu.vector_store %arg5[%c0_48, %c0_49], %193 {strides = array<i32>} : memref<8x128xf32, #tpu.memory_space<vmem>>, vector<8x128xf32>,
    } else {
    }
    return
  }
  func.func @transform_0(%arg0: i32) -> (i32, i32, i32) {
    %c0_i32 = arith.constant 0 : i32
    %c0_i32_0 = arith.constant 0 : i32
    %c0_i32_1 = arith.constant 0 : i32
    return %arg0, %c0_i32, %c0_i32_0 : i32, i32, i32
  }
  func.func @transform_1(%arg0: i32) -> (i32, i32) {
    %c0_i32 = arith.constant 0 : i32
    %c0_i32_0 = arith.constant 0 : i32
    return %arg0, %c0_i32 : i32, i32
  }
  func.func @transform_2(%arg0: i32) -> (i32, i32) {
    %c0_i32 = arith.constant 0 : i32
    %c0_i32_0 = arith.constant 0 : i32
    %c0_i32_1 = arith.constant 0 : i32
    return %c0_i32, %c0_i32_0 : i32, i32
  }
  func.func @transform_3(%arg0: i32) -> (i32, i32) {
    %c0_i32 = arith.constant 0 : i32
    %c0_i32_0 = arith.constant 0 : i32
    %c0_i32_1 = arith.constant 0 : i32
    return %c0_i32, %c0_i32_0 : i32, i32
  }
  func.func @transform_4(%arg0: i32) -> (i32, i32) {
    %c0_i32 = arith.constant 0 : i32
    %c0_i32_0 = arith.constant 0 : i32
    return %arg0, %c0_i32 : i32, i32
  }
}

</mosaic_0001>

<bundles_post_ra>
// kernel: set_criterion_losses.1
= control target key start
LH: loop header
LB: loop body
LE: loop exit
PB: predicated region body
PF: predicated region fallthrough
CT: control target
= control target key end

     0   :  { %s1290_s15 = smov 0   ;;  %s1807_s0 = inlined_call_operand.vmem [shape: bf16[16,8,5], index: 0, kind: input, shape index: {}]   ;;  %s1808_s1 = inlined_call_operand.vmem [shape: s32[16,8], index: 1, kind: input, shape index: {}]   ;;  %s1809_s2 = inlined_call_operand.vmem [shape: f32[8,128], index: 2, kind: input, shape index: {}]   ;;  %s1810_s3 = inlined_call_operand.vmem [shape: f32[1,128], index: 3, kind: input, shape index: {}]   ;;  %s1811_s4 = inlined_call_operand.vmem [shape: f32[16,128], index: 4, kind: output, shape index: {}]  }
   0x1 LB: > { %s1296_s16 = sadd.s32 4294967295, %s1260_s15   ;;  %p1139_p0 = scmp.ge.s32.totalorder %s1260_s15, 1  ;;  %s1260_s15 = sphi %s1290_s15, %s14_s15  }
   0x2   : > { %p172_p1 = scmp.lt.s32.totalorder %s1260_s15, 3 }
   0x4   : > { %p173_p2 = pnand %p1139_p0, %p172_p1 }
   0x5   : > { %s1140_s17 = sshll.u32 (!%p173_p2), %s1296_s16, 3  ;;  %vm235_vm0 = vcmask (!%p173_p2), 39936   ;;  %p207_p4 = scmp.lt.s32.totalorder (!%p173_p2), %s1296_s16, 1  ;;  %v324_v20 = vlaneseq (!%p173_p2)  ;;  %v1262_v38 = vmov (!%p173_p2), 0.0  }
   0x6   : > { %176 = sbr.rel (%p173_p2) target bundleno = 1036 (0x40c), region = 36  ;;  %p202_p3 = scmp.lt.s32.totalorder (!%p173_p2), %s1140_s17, 15 }
   0x7   : > { %v1341_v21 = vshrl.u32 (!%p173_p2), %v324_v20, 7  ;;  %v1389_v44 = vand.u32 (!%p173_p2), 127, %v324_v20  ;;  %p1169_p5 = scmp.ne.s32.totalorder (!%p173_p2), %s1296_s16, 0 }
   0x9   : > { %v335_v22 = vsub.s32 (!%p173_p2), 1, %v1341_v21  ;;  %v342_v25 = vsub.s32 (!%p173_p2), 2, %v1341_v21  ;;  %v1354_v26 = vsub.s32 (!%p173_p2), 0, %v1341_v21  ;;  %v349_v28 = vsub.s32 (!%p173_p2), 3, %v1341_v21 }
   0xa   : > { %v356_v30 = vsub.s32 (!%p173_p2), 4, %v1341_v21  ;;  %v363_v32 = vsub.s32 (!%p173_p2), 5, %v1341_v21  ;;  %v370_v34 = vsub.s32 (!%p173_p2), 6, %v1341_v21  ;;  %v377_v36 = vsub.s32 (!%p173_p2), 7, %v1341_v21 }
   0xd   : > { %s1813_s17 = smov (!%p202_p3, %s1140_s17), 15 }
   0xe   : > { %s1141_s18 = sshll.u32 %s1813_s17, 2 }
   0xf   : > { %s205_s21 = scalar_lea.vmem %s1807_s0, %s1141_s18 }
  0x10   : > { %v1188_v0 = vld [vmem:[%s205_s21 + $0x8] sm:$0xff]   ;;  %v1173_v1 = vld [vmem:[%s205_s21] sm:$0xff]   ;;  %v1189_v6 = vld [vmem:[%s205_s21 + $0x10] sm:$0xff]   ;;  %s1338_s22 = scalar_select %p207_p4, %s1296_s16, 1 }
  0x11   : > { %v1304_v2 = vunpack.c.l.bf16 %v1188_v0  ;;  %v1306_v3 = vunpack.c.l.bf16 %v1173_v1  ;;  %v1308_v4 = vunpack.c.h.bf16 %v1188_v0  ;;  %v1310_v5 = vunpack.c.h.bf16 %v1173_v1  ;;  %v1190_v13 = vld [vmem:[%s205_s21 + $0x18] sm:$0xff]  }
  0x12   : > { %v1320_v11 = vunpack.c.h.bf16 %v1189_v6  ;;  %v1322_v12 = vunpack.c.l.bf16 %v1189_v6  ;;  %v1328_v16 = vunpack.c.h.bf16 %v1190_v13  ;;  %v1330_v17 = vunpack.c.l.bf16 %v1190_v13  ;;  %s1142_s23 = sshll.u32 %s1338_s22, 3 }
  0x13   : > { %v242_v7 = vsel %vm235_vm0, %v1304_v2, -inf  ;;  %v236_v8 = vsel %vm235_vm0, %v1306_v3, -inf  ;;  %v245_v9 = vsel %vm235_vm0, %v1308_v4, -inf  ;;  %v239_v10 = vsel %vm235_vm0, %v1310_v5, -inf  ;;  %s210_s26 = scalar_lea.vmem %s1808_s1, %s1142_s23  ;;  %s1785_s8 = scalar_lea.vmem %s1811_s4, %s1142_s23 }
  0x14   : > { %243 = vmax.xlane.f32.xlu1 %v242_v7  ;;  %237 = vmax.xlane.f32.xlu0 %v236_v8  ;;  %v251_v14 = vsel %vm235_vm0, %v1320_v11, -inf  ;;  %v248_v15 = vsel %vm235_vm0, %v1322_v12, -inf  ;;  %v257_v18 = vsel %vm235_vm0, %v1328_v16, -inf  ;;  %v254_v19 = vsel %vm235_vm0, %v1330_v17, -inf  ;;  %v1349_v23 = vld [vmem:[%s210_s26] sm:$0xff] }
  0x15   : > { %v336_v24 = vrot.slane %v1349_v23, %v335_v22  ;;  %v343_v27 = vrot.slane %v1349_v23, %v342_v25  ;;  %v329_v29 = vrot.slane %v1349_v23, %v1354_v26  ;;  %v350_v31 = vrot.slane %v1349_v23, %v349_v28 }
  0x16   : > { %v357_v33 = vrot.slane %v1349_v23, %v356_v30  ;;  %vm232_vm1 = vcmp.ne.s32.totalorder %v1349_v23, 4  ;;  %v364_v35 = vrot.slane %v1349_v23, %v363_v32  ;;  %v371_v37 = vrot.slane %v1349_v23, %v370_v34 }
  0x17   : > { %v1380_v39 = vsel %vm232_vm1, 1.0, %v1262_v38  ;;  %v378_v40 = vrot.slane %v1349_v23, %v377_v36 }
  0x18   : > { %246 = vmax.xlane.f32.xlu1 %v245_v9  ;;  %240 = vmax.xlane.f32.xlu0 %v239_v10  ;;  %v688_v41 = vrot.slane %v1380_v39, %v1354_v26  ;;  %v695_v42 = vrot.slane %v1380_v39, %v335_v22  ;;  %v702_v43 = vrot.slane %v1380_v39, %v342_v25 }
  0x1c   : > { %252 = vmax.xlane.f32.xlu1 %v251_v14  ;;  %249 = vmax.xlane.f32.xlu0 %v248_v15 }
  0x20   : > { %258 = vmax.xlane.f32.xlu1 %v257_v18  ;;  %255 = vmax.xlane.f32.xlu0 %v254_v19 }
  0x31   : > { %338 = vbcast.lane.b32.xlu1 %v336_v24, 256 }
  0x35   : > { %345 = vbcast.lane.b32.xlu1 %v343_v27, 256 }
  0x36   : > { %331 = vbcast.lane.b32.xlu0 %v329_v29, 256 }
  0x39   : > { %352 = vbcast.lane.b32.xlu1 %v350_v31, 256 }
  0x3a   : > { %359 = vbcast.lane.b32.xlu0 %v357_v33, 256 }
  0x3d   : > { %366 = vbcast.lane.b32.xlu1 %v364_v35, 256 }
  0x3e   : > { %373 = vbcast.lane.b32.xlu0 %v371_v37, 256  ;;  %v709_v37 = vrot.slane %v1380_v39, %v349_v28 }
  0x41   : > { %380 = vbcast.lane.b32.xlu1 %v378_v40, 256  ;;  %v716_v40 = vrot.slane %v1380_v39, %v356_v30 }
  0x42   : > { %690 = vbcast.lane.b32.xlu0 %v688_v41, 256  ;;  %v723_v41 = vrot.slane %v1380_v39, %v363_v32 }
  0x45   : > { %697 = vbcast.lane.b32.xlu1 %v695_v42, 256  ;;  %v730_v42 = vrot.slane %v1380_v39, %v370_v34 }
  0x46   : > { %704 = vbcast.lane.b32.xlu0 %v702_v43, 256  ;;  %v737_v43 = vrot.slane %v1380_v39, %v377_v36 }
  0xa1   : > { %v1391_v45 = vpop.xlane.xlu1 %243  ;;  %v1393_v46 = vpop.xlane.xlu0 %237 }
  0xa2   : > { %vm526_vm2 = vcmp.eq.f32.partialorder %v1304_v2, %v1391_v45  ;;  %vm524_vm3 = vcmp.eq.f32.partialorder %v1306_v3, %v1393_v46  ;;  %v1504_v28 = vsub.f32 %v1306_v3, %v1393_v46 }
  0xa3   : > { %v534_v47 = vsel %vm526_vm2, %v1389_v44, 5  ;;  %v532_v48 = vsel %vm524_vm3, %v1389_v44, 5 }
  0xa4   : > { %v1402_v49 = vsel %vm235_vm0, %v532_v48, 2147483647  ;;  %v1410_v53 = vsel %vm235_vm0, %v534_v47, 2147483647  ;;  %v268_v30 = vmul.f32 1.442695, %v1504_v28 }
  0xa5   : > { %v1404_v50 = vpop.xlane.xlu1 %246  ;;  %v1406_v51 = vpop.xlane.xlu0 %240  ;;  %v542_v52 = vshra.s32 %v1402_v49, 16  ;;  %v572_v57 = vshra.s32 %v1410_v53, 16 }
  0xa6   : > { %vm527_vm4 = vcmp.eq.f32.partialorder %v1308_v4, %v1404_v50  ;;  %vm525_vm5 = vcmp.eq.f32.partialorder %v1310_v5, %v1406_v51  ;;  %1218 = vpow2.f32 %v268_v30 }
  0xa7   : > { %v535_v54 = vsel %vm527_vm4, %v1389_v44, 5  ;;  %v1417_v55 = vcvt.s32.f32 %v542_v52  ;;  %v533_v56 = vsel %vm525_vm5, %v1389_v44, 5  ;;  %v1437_v63 = vcvt.s32.f32 %v572_v57 }
  0xa8   : > { %v1427_v60 = vsel %vm235_vm0, %v533_v56, 2147483647  ;;  %v1432_v61 = vsel %vm235_vm0, %v535_v54, 2147483647 }
  0xa9   : > { %v1421_v58 = vpop.xlane.xlu1 %252  ;;  %545 = vmin.xlane.f32.xlu0 %v1417_v55  ;;  %v1424_v59 = vpop.xlane.xlu0 %249  ;;  %v557_v1 = vshra.s32 %v1427_v60, 16  ;;  %v587_v8 = vshra.s32 %v1432_v61, 16 }
  0xaa   : > { %vm529_vm6 = vcmp.eq.f32.partialorder %v1320_v11, %v1421_v58  ;;  %vm528_vm7 = vcmp.eq.f32.partialorder %v1322_v12, %v1424_v59 }
  0xab   : > { %v537_v62 = vsel %vm529_vm6, %v1389_v44, 5  ;;  %v536_v0 = vsel %vm528_vm7, %v1389_v44, 5  ;;  %v1452_v10 = vcvt.s32.f32 %v557_v1  ;;  %v1461_v15 = vcvt.s32.f32 %v587_v8 }
  0xac   : > { %v1448_v9 = vsel %vm235_vm0, %v536_v0, 2147483647  ;;  %v1455_v13 = vsel %vm235_vm0, %v537_v62, 2147483647  ;;  %v541_v62 = vand.u32 65535, %v1402_v49  ;;  %v1531_v1 = vsub.f32 %v1304_v2, %v1391_v45 }
  0xad   : > { %v1441_v6 = vpop.xlane.xlu1 %258  ;;  %575 = vmin.xlane.f32.xlu0 %v1437_v63  ;;  %v1444_v7 = vpop.xlane.xlu0 %255  ;;  %560 = vmin.xlane.f32.xlu1 %v1452_v10  ;;  %v602_v18 = vshra.s32 %v1448_v9, 16  ;;  %v617_v20 = vshra.s32 %v1455_v13, 16  ;;  %v1544_v49 = vsub.f32 %v1310_v5, %v1406_v51  ;;  %v556_v2 = vand.u32 65535, %v1427_v60 }
  0xae   : > { %vm531_vm8 = vcmp.eq.f32.partialorder %v1328_v16, %v1441_v6  ;;  %vm530_vm9 = vcmp.eq.f32.partialorder %v1330_v17, %v1444_v7  ;;  %v272_v45 = vmul.f32 1.442695, %v1531_v1  ;;  %v1558_v5 = vsub.f32 %v1320_v11, %v1421_v58 }
  0xaf   : > { %v538_v14 = vsel %vm530_vm9, %v1389_v44, 5  ;;  %v539_v19 = vsel %vm531_vm8, %v1389_v44, 5  ;;  %v1469_v24 = vcvt.s32.f32 %v602_v18  ;;  %v1473_v25 = vcvt.s32.f32 %v617_v20 }
  0xb0   : > { %v1467_v22 = vsel %vm235_vm0, %v538_v14, 2147483647  ;;  %v1477_v29 = vsel %vm235_vm0, %v539_v19, 2147483647  ;;  %v1219_v32 = vpop.eup %1218  ;;  %v543_v14 = vcvt.s32.f32 %v541_v62  ;;  %v571_v18 = vand.u32 65535, %v1410_v53 }
  0xb1   : > { %590 = vmin.xlane.f32.xlu1 %v1461_v15  ;;  %605 = vmin.xlane.f32.xlu0 %v1469_v24  ;;  %v632_v27 = vshra.s32 %v1467_v22, 16  ;;  %v647_v31 = vshra.s32 %v1477_v29, 16  ;;  %v284_v47 = vsel %vm235_vm0, %v1219_v32, 0.0  ;;  %v1508_v48 = vpop.permute.xlu1 %338  ;;  %v1510_v34 = vpop.permute.xlu0 %331  ;;  %v1538_v19 = vsub.f32 %v1308_v4, %v1404_v50 }
  0xb2   : > { %v270_v50 = vmul.f32 1.442695, %v1544_v49  ;;  %v558_v60 = vcvt.s32.f32 %v556_v2  ;;  %1220 = vpow2.f32 %v272_v45  ;;  %v278_v58 = vmul.f32 1.442695, %v1558_v5 }
  0xb3   : > { %v1480_v33 = vcvt.s32.f32 %v632_v27  ;;  %v1484_v35 = vcvt.s32.f32 %v647_v31  ;;  %v573_v31 = vcvt.s32.f32 %v571_v18  ;;  %v274_v4 = vmul.f32 1.442695, %v1538_v19 }
  0xb4   : > { %v1584_v30 = vsub.f32 %v1330_v17, %v1444_v7  ;;  %v646_v7 = vand.u32 65535, %v1477_v29  ;;  %vm383_vm4 = vcmp.eq.s32.totalorder %v1389_v44, %v1508_v48  ;;  %vm382_vm5 = vcmp.eq.s32.totalorder %v1389_v44, %v1510_v34 }
  0xb5   : > { %620 = vmin.xlane.f32.xlu1 %v1473_v25  ;;  %635 = vmin.xlane.f32.xlu0 %v1480_v33  ;;  %v1512_v52 = vpop.permute.xlu0 %359  ;;  %v1514_v36 = vpop.permute.xlu1 %345  ;;  %1222 = vpow2.f32 %v274_v4 }
  0xb6   : > { %1224 = vpow2.f32 %v270_v50  ;;  %v648_v2 = vcvt.s32.f32 %v646_v7  ;;  %vm384_vm6 = vcmp.eq.s32.totalorder %v1389_v44, %v1514_v36  ;;  %vm386_vm8 = vcmp.eq.s32.totalorder %v1389_v44, %v1512_v52 }
  0xb7   : > { %1226 = vpow2.f32 %v278_v58  ;;  %v1263_v58 = vmov 0  }
  0xb8   : > { %1216 = vset.pattern.permute.xlu0 %v1263_v58  ;;  %1217 = vset.pattern.permute.xlu1 %v1263_v58 }
  0xb9   : > { %650 = vmin.xlane.f32.xlu1 %v1484_v35  ;;  %v1516_v54 = vpop.permute.xlu0 %373  ;;  %v1518_v56 = vpop.permute.xlu1 %352 }
  0xba   : > { %vm385_vm7 = vcmp.eq.s32.totalorder %v1389_v44, %v1518_v56 }
  0xbd   : > { %v1520_v3 = vpop.permute.xlu0 %690  ;;  %v1522_v46 = vpop.permute.xlu1 %366 }
  0xbe   : > { %vm387_vm9 = vcmp.eq.s32.totalorder %v1389_v44, %v1522_v46 }
  0xc1   : > { %v1524_v57 = vpop.permute.xlu0 %704  ;;  %v1527_v0 = vpop.permute.xlu1 %380 }
  0xc5   : > { %v1546_v27 = vpop.permute.xlu1 %697 }
  0xca   : > { %711 = vbcast.lane.b32.xlu1 %v709_v37, 256  ;;  %v586_v37 = vand.u32 65535, %v1432_v61 }
  0xcb   : > { %718 = vbcast.lane.b32.xlu0 %v716_v40, 256  ;;  %v601_v40 = vand.u32 65535, %v1448_v9 }
  0xce   : > { %725 = vbcast.lane.b32.xlu1 %v723_v41, 256  ;;  %v1566_v41 = vsub.f32 %v1322_v12, %v1424_v59  ;;  %v603_v12 = vcvt.s32.f32 %v601_v40  ;;  %v616_v59 = vand.u32 65535, %v1455_v13  ;;  %v1146_v40 = vsel %vm383_vm4, 1.0, %v1262_v38 }
  0xcf   : > { %732 = vbcast.lane.b32.xlu0 %v730_v42, 256  ;;  %v588_v42 = vcvt.s32.f32 %v586_v37  ;;  %vm487_vm4 = vcmask 1041409  }
  0xd2   : > { %739 = vbcast.lane.b32.xlu1 %v737_v43, 256  ;;  %v276_v43 = vmul.f32 1.442695, %v1566_v41 }
  0xd4   : > { %1228 = vpow2.f32 %v276_v43  ;;  %v1147_v43 = vsel %vm384_vm6, 1.0, %v1262_v38 }
  0xee   : > { %285 = vadd.xlane.f32.xlu0 %v284_v47  ;;  %v618_v47 = vcvt.s32.f32 %v616_v59  ;;  %v407_v59 = vmul.f32 %v1146_v40, %v1544_v49 }
 0x136   : > { %v1533_v8 = vpop.xlane.xlu0 %545 }
 0x137   : > { %vm547_vm10 = vcmp.eq.f32.partialorder %v1417_v55, %v1533_v8 }
 0x138   : > { %v548_v20 = vsel %vm547_vm10, %v543_v14, inf  ;;  %v1221_v14 = vpop.eup %1220  ;;  %vm388_vm10 = vcmp.eq.s32.totalorder %v1389_v44, %v1516_v54 }
 0x139   : > { %549 = vmin.xlane.f32.xlu0 %v548_v20  ;;  %v1223_v18 = vpop.eup %1222 }
 0x13a   : > { %v1550_v53 = vpop.xlane.xlu0 %575  ;;  %v1560_v55 = vpop.xlane.xlu1 %560  ;;  %v293_v4 = vsel %vm235_vm0, %v1223_v18, 0.0 }
 0x13b   : > { %vm577_vm11 = vcmp.eq.f32.partialorder %v1437_v63, %v1550_v53  ;;  %vm562_vm12 = vcmp.eq.f32.partialorder %v1452_v10, %v1560_v55  ;;  %v1573_v63 = vsub.f32 %v1328_v16, %v1441_v6  ;;  %v631_v10 = vand.u32 65535, %v1467_v22  ;;  %v1225_v29 = vpop.eup %1224 }
 0x13c   : > { %v578_v51 = vsel %vm577_vm11, %v573_v31, inf  ;;  %v563_v11 = vsel %vm562_vm12, %v558_v60, inf  ;;  %v287_v31 = vsel %vm235_vm0, %v1225_v29, 0.0  ;;  %vm389_vm11 = vcmp.eq.s32.totalorder %v1389_v44, %v1527_v0 }
 0x13d   : > { %579 = vmin.xlane.f32.xlu0 %v578_v51  ;;  %564 = vmin.xlane.f32.xlu1 %v563_v11  ;;  %v282_v13 = vmul.f32 1.442695, %v1573_v63  ;;  %v633_v17 = vcvt.s32.f32 %v631_v10  ;;  %v1145_v11 = vsel %vm382_vm5, 1.0, %v1262_v38  ;;  %vm503_vm12 = vcmask 64512  }
 0x13e   : > { %v1575_v61 = vpop.xlane.xlu1 %590  ;;  %v1577_v9 = vpop.xlane.xlu0 %605  ;;  %v406_v10 = vmul.f32 %v1145_v11, %v1504_v28  ;;  %v408_v28 = vmul.f32 %v1147_v43, %v1531_v1  ;;  %v567_v40 = vcvt.f32.s32 %v1560_v55  ;;  %vm489_vm5 = vcmask 1042434  }
 0x13f   : > { %vm592_vm13 = vcmp.eq.f32.partialorder %v1461_v15, %v1575_v61  ;;  %vm607_vm14 = vcmp.eq.f32.partialorder %v1469_v24, %v1577_v9  ;;  %v280_v15 = vmul.f32 1.442695, %v1584_v30  ;;  %1230 = vpow2.f32 %v282_v13 }
 0x140   : > { %v593_v16 = vsel %vm592_vm13, %v588_v42, inf  ;;  %v608_v6 = vsel %vm607_vm14, %v603_v12, inf  ;;  %v414_v13 = vsel %vm235_vm0, %v406_v10, 0.0 }
 0x141   : > { %594 = vmin.xlane.f32.xlu1 %v593_v16  ;;  %609 = vmin.xlane.f32.xlu0 %v608_v6  ;;  %1232 = vpow2.f32 %v280_v15  ;;  %v1148_v16 = vsel %vm385_vm7, 1.0, %v1262_v38  ;;  %v417_v6 = vsel %vm235_vm0, %v407_v59, 0.0  ;;  %v420_v15 = vsel %vm235_vm0, %v408_v28, 0.0 }
 0x142   : > { %v1591_v22 = vpop.xlane.xlu1 %620  ;;  %v1593_v32 = vpop.xlane.xlu0 %635  ;;  %v409_v49 = vmul.f32 %v1148_v16, %v1538_v19 }
 0x143   : > { %vm622_vm15 = vcmp.eq.f32.partialorder %v1473_v25, %v1591_v22  ;;  %vm637_vm2 = vcmp.eq.f32.partialorder %v1480_v33, %v1593_v32  ;;  %v290_v25 = vsel %vm235_vm0, %v1221_v14, 0.0  ;;  %v1227_v33 = vpop.eup %1226  ;;  %v627_v10 = vcvt.f32.s32 %v1591_v22 }
 0x144   : > { %v623_v24 = vsel %vm622_vm15, %v618_v47, inf  ;;  %v638_v62 = vsel %vm637_vm2, %v633_v17, inf  ;;  %v1229_v50 = vpop.eup %1228  ;;  %v299_v51 = vsel %vm235_vm0, %v1227_v33, 0.0  ;;  %v1149_v47 = vsel %vm386_vm8, 1.0, %v1262_v38 }
 0x145   : > { %624 = vmin.xlane.f32.xlu1 %v623_v24  ;;  %639 = vmin.xlane.f32.xlu0 %v638_v62  ;;  %v296_v60 = vsel %vm235_vm0, %v1229_v50, 0.0  ;;  %v1150_v17 = vsel %vm387_vm9, 1.0, %v1262_v38  ;;  %v423_v7 = vsel %vm235_vm0, %v409_v49, 0.0  ;;  %v410_v1 = vmul.f32 %v1149_v47, %v1566_v41 }
 0x146   : > { %v1601_v20 = vpop.xlane.xlu1 %650  ;;  %v411_v19 = vmul.f32 %v1150_v17, %v1558_v5  ;;  %v1151_v24 = vsel %vm388_vm10, 1.0, %v1262_v38  ;;  %v1152_v62 = vsel %vm389_vm11, 1.0, %v1262_v38  ;;  %v642_v55 = vcvt.f32.s32 %v1593_v32 }
 0x147   : > { %vm652_vm3 = vcmp.eq.f32.partialorder %v1484_v35, %v1601_v20  ;;  %v426_v18 = vsel %vm235_vm0, %v410_v1, 0.0  ;;  %v412_v29 = vmul.f32 %v1151_v24, %v1584_v30  ;;  %v657_v49 = vcvt.f32.s32 %v1601_v20 }
 0x148   : > { %v653_v45 = vsel %vm652_vm3, %v648_v2, inf  ;;  %v429_v14 = vsel %vm235_vm0, %v411_v19, 0.0  ;;  %v413_v2 = vmul.f32 %v1152_v62, %v1573_v63  ;;  %v628_v47 = vshll.u32 %v627_v10, 16 }
 0x149   : > { %654 = vmin.xlane.f32.xlu1 %v653_v45  ;;  %291 = vadd.xlane.f32.xlu0 %v290_v25  ;;  %v1231_v35 = vpop.eup %1230  ;;  %v432_v41 = vsel %vm235_vm0, %v412_v29, 0.0  ;;  %v839_v45 = vsel %vm503_vm12, %v1380_v39, 0.0  ;;  %v1654_v25 = vpop.permute.xlu0 %718  ;;  %v643_v17 = vshll.u32 %v642_v55, 16  ;;  %vm491_vm9 = vcmask 1043459  }
 0x14a   : > { %v305_v42 = vsel %vm235_vm0, %v1231_v35, 0.0  ;;  %v435_v5 = vsel %vm235_vm0, %v413_v2, 0.0  ;;  %v1658_v63 = vpop.permute.xlu1 %711  ;;  %vm493_vm10 = vcmask 1044484  }
 0x14b   : > { %v1233_v37 = vpop.eup %1232 }
 0x14c   : > { %v302_v12 = vsel %vm235_vm0, %v1233_v37, 0.0 }
 0x14d   : > { %288 = vadd.xlane.f32.xlu1 %v287_v31  ;;  %294 = vadd.xlane.f32.xlu0 %v293_v4  ;;  %v1656_v33 = vpop.permute.xlu0 %732  ;;  %v552_v31 = vcvt.f32.s32 %v1533_v8  ;;  %v612_v8 = vcvt.f32.s32 %v1577_v9 }
 0x14e   : > { %v1663_v4 = vpop.permute.xlu1 %725 }
 0x14f   : > { %v553_v35 = vshll.u32 %v552_v31, 16  ;;  %v613_v9 = vshll.u32 %v612_v8, 16 }
 0x151   : > { %300 = vadd.xlane.f32.xlu1 %v299_v51  ;;  %297 = vadd.xlane.f32.xlu0 %v296_v60  ;;  %v582_v51 = vcvt.f32.s32 %v1550_v53 }
 0x152   : > { %v1666_v37 = vpop.permute.xlu1 %739 }
 0x153   : > { %v583_v58 = vshll.u32 %v582_v51, 16 }
 0x155   : > { %306 = vadd.xlane.f32.xlu1 %v305_v42  ;;  %303 = vadd.xlane.f32.xlu0 %v302_v12  ;;  %v597_v12 = vcvt.f32.s32 %v1575_v61 }
 0x157   : > { %v598_v61 = vshll.u32 %v597_v12, 16 }
 0x159   : > { %418 = vadd.xlane.f32.xlu1 %v417_v6  ;;  %415 = vadd.xlane.f32.xlu0 %v414_v13  ;;  %v568_v6 = vshll.u32 %v567_v40, 16 }
 0x15d   : > { %424 = vadd.xlane.f32.xlu1 %v423_v7  ;;  %421 = vadd.xlane.f32.xlu0 %v420_v15  ;;  %v658_v7 = vshll.u32 %v657_v49, 16 }
 0x161   : > { %430 = vadd.xlane.f32.xlu1 %v429_v14  ;;  %427 = vadd.xlane.f32.xlu0 %v426_v18 }
 0x165   : > { %436 = vadd.xlane.f32.xlu1 %v435_v5  ;;  %433 = vadd.xlane.f32.xlu0 %v432_v41 }
 0x169   : > { %840 = vadd.xlane.f32.xlu1 %v839_v45 }
 0x17b   : > { %v1660_v30 = vpop.xlane.xlu0 %285 }
 0x1c6   : > { %v550_v50 = vpop.xlane.xlu0 %549 }
 0x1c7   : > { %v551_v60 = vcvt.f32.s32 %v550_v50 }
 0x1c9   : > { %v554_v39 = vadd.s32 %v553_v35, %v551_v60 }
 0x1ca   : > { %v580_v11 = vpop.xlane.xlu0 %579  ;;  %v565_v53 = vpop.xlane.xlu1 %564 }
 0x1cb   : > { %vm660_vm0 = vcmp.eq.s32.totalorder %v554_v39, %v1510_v34  ;;  %v581_v42 = vcvt.f32.s32 %v580_v11  ;;  %v566_v13 = vcvt.f32.s32 %v565_v53  ;;  %v1679_v34 = vsub.s32 %v1389_v44, %v1341_v21 }
 0x1cc   : > { %v1153_v59 = vsel %vm660_vm0, 1.0, %v1262_v38  ;;  %vm849_vm13 = vcmp.ne.s32.totalorder %v554_v39, 4 }
 0x1cd   : > { %v584_v43 = vadd.s32 %v583_v58, %v581_v42  ;;  %v749_v16 = vmul.f32 %v1153_v59, %v1520_v3  ;;  %v569_v28 = vadd.s32 %v568_v6, %v566_v13  ;;  %v1161_v14 = vsel %vm849_vm13, 1.0, %v1262_v38 }
 0x1ce   : > { %v595_v3 = vpop.xlane.xlu1 %594  ;;  %v610_v22 = vpop.xlane.xlu0 %609  ;;  %v884_v31 = vrot.slane %v1161_v14, %v1679_v34 }
 0x1cf   : > { %766 = vperm.xlu0 %1216, %v749_v16   ;;  %vm662_vm14 = vcmp.eq.s32.totalorder %v584_v43, %v1514_v36  ;;  %vm851_vm15 = vcmp.ne.s32.totalorder %v584_v43, 4  ;;  %vm661_vm2 = vcmp.eq.s32.totalorder %v569_v28, %v1508_v48  ;;  %vm850_vm3 = vcmp.ne.s32.totalorder %v569_v28, 4 }
 0x1d0   : > { %v596_v32 = vcvt.f32.s32 %v595_v3  ;;  %v611_v20 = vcvt.f32.s32 %v610_v22  ;;  %v1162_v15 = vsel %vm850_vm3, 1.0, %v1262_v38  ;;  %v1154_v19 = vsel %vm661_vm2, 1.0, %v1262_v38 }
 0x1d1   : > { %v750_v62 = vmul.f32 %v1154_v19, %v1546_v27  ;;  %v1163_v48 = vsel %vm851_vm15, 1.0, %v1262_v38  ;;  %v1155_v29 = vsel %vm662_vm14, 1.0, %v1262_v38  ;;  %v888_v5 = vrot.slane %v1162_v15, %v1679_v34 }
 0x1d2   : > { %v599_v1 = vadd.s32 %v598_v61, %v596_v32  ;;  %v614_v24 = vadd.s32 %v613_v9, %v611_v20  ;;  %v625_v18 = vpop.xlane.xlu1 %624  ;;  %v640_v2 = vpop.xlane.xlu0 %639  ;;  %v751_v36 = vmul.f32 %v1155_v29, %v1524_v57  ;;  %v892_v35 = vrot.slane %v1163_v48, %v1679_v34 }
 0x1d3   : > { %769 = vperm.xlu1 %1217, %v750_v62   ;;  %v626_v41 = vcvt.f32.s32 %v625_v18  ;;  %v641_v45 = vcvt.f32.s32 %v640_v2  ;;  %v913_v57 = vsel %vm487_vm4, %v888_v5, %v884_v31  ;;  %vm495_vm14 = vcmask 1045509  }
 0x1d4   : > { %vm663_vm6 = vcmp.eq.s32.totalorder %v599_v1, %v1518_v56  ;;  %vm852_vm7 = vcmp.ne.s32.totalorder %v599_v1, 4  ;;  %vm853_vm8 = vcmp.ne.s32.totalorder %v614_v24, 4  ;;  %vm664_vm11 = vcmp.eq.s32.totalorder %v614_v24, %v1512_v52 }
 0x1d5   : > { %v1164_v27 = vsel %vm852_vm7, 1.0, %v1262_v38  ;;  %v1165_v50 = vsel %vm853_vm8, 1.0, %v1262_v38  ;;  %v1700_v51 = vadd.s32 %v628_v47, %v626_v41  ;;  %v644_v60 = vadd.s32 %v643_v17, %v641_v45 }
 0x1d6   : > { %v655_v39 = vpop.xlane.xlu1 %654  ;;  %v292_v40 = vpop.xlane.xlu0 %291  ;;  %v1156_v11 = vsel %vm663_vm6, 1.0, %v1262_v38  ;;  %v896_v58 = vrot.slane %v1164_v27, %v1679_v34  ;;  %v900_v12 = vrot.slane %v1165_v50, %v1679_v34  ;;  %v1157_v13 = vsel %vm664_vm11, 1.0, %v1262_v38 }
 0x1d7   : > { %v656_v42 = vcvt.f32.s32 %v655_v39  ;;  %772 = vperm.xlu1 %1217, %v751_v36   ;;  %vm854_vm0 = vcmp.ne.s32.totalorder %v1700_v51, 4  ;;  %vm855_vm13 = vcmp.ne.s32.totalorder %v644_v60, 4  ;;  %v752_v10 = vmul.f32 %v1156_v11, %v1658_v63 }
 0x1d8   : > { %v1166_v8 = vsel %vm854_vm0, 1.0, %v1262_v38  ;;  %v1167_v59 = vsel %vm855_vm13, 1.0, %v1262_v38  ;;  %v914_v55 = vsel %vm489_vm5, %v892_v35, %v913_v57  ;;  %vm666_vm15 = vcmp.eq.s32.totalorder %v644_v60, %v1516_v54 }
 0x1d9   : > { %v659_v56 = vadd.s32 %v658_v7, %v656_v42  ;;  %v904_v53 = vrot.slane %v1166_v8, %v1679_v34  ;;  %v908_v43 = vrot.slane %v1167_v59, %v1679_v34  ;;  %vm497_vm3 = vcmask 1046534  }
 0x1da   : > { %v289_v16 = vpop.xlane.xlu1 %288  ;;  %v295_v6 = vpop.xlane.xlu0 %294  ;;  %v915_v49 = vsel %vm491_vm9, %v896_v58, %v914_v55  ;;  %vm499_vm6 = vcmask 1047559   ;;  %v753_v9 = vmul.f32 %v1157_v13, %v1654_v25  ;;  %v1159_v54 = vsel %vm666_vm15, 1.0, %v1262_v38 }
 0x1db   : > { %vm856_vm2 = vcmp.ne.s32.totalorder %v659_v56, 4  ;;  %775 = vperm.xlu1 %1217, %v752_v10   ;;  %v916_v61 = vsel %vm493_vm10, %v900_v12, %v915_v49  ;;  %1234 = vlog2.f32 %v289_v16  ;;  %vm667_vm7 = vcmp.eq.s32.totalorder %v659_v56, %v1527_v0 }
 0x1dc   : > { %v1168_v63 = vsel %vm856_vm2, 1.0, %v1262_v38  ;;  %v917_v52 = vsel %vm495_vm14, %v904_v53, %v916_v61  ;;  %1236 = vlog2.f32 %v1660_v30  ;;  %v755_v25 = vmul.f32 %v1159_v54, %v1656_v33 }
 0x1dd   : > { %v912_v28 = vrot.slane %v1168_v63, %v1679_v34  ;;  %v918_v22 = vsel %vm497_vm3, %v908_v43, %v917_v52  ;;  %1238 = vlog2.f32 %v292_v40  ;;  %v1160_v7 = vsel %vm667_vm7, 1.0, %v1262_v38 }
 0x1de   : > { %v301_v47 = vpop.xlane.xlu1 %300  ;;  %v298_v3 = vpop.xlane.xlu0 %297  ;;  %1240 = vlog2.f32 %v295_v6  ;;  %v756_v15 = vmul.f32 %v1160_v7, %v1666_v37  ;;  %vm665_vm8 = vcmp.eq.s32.totalorder %v1700_v51, %v1522_v46  ;;  %v1264_v51 = vmov 0.1  }
 0x1df   : > { %778 = vperm.xlu1 %1217, %v753_v9   ;;  %v919_v32 = vsel %vm499_vm6, %v912_v28, %v918_v22  ;;  %1242 = vlog2.f32 %v298_v3  ;;  %v1158_v52 = vsel %vm665_vm8, 1.0, %v1262_v38  ;;  %v446_v22 = vsel %vm232_vm1, 1.0, %v1264_v51 }
 0x1e0   : > { %1244 = vlog2.f32 %v301_v47  ;;  %v921_v62 = vsel %vm503_vm12, %v919_v32, 0.0  ;;  %v754_v3 = vmul.f32 %v1158_v52, %v1663_v4  ;;  %v514_v38 = vsel %vm503_vm12, %v446_v22, 0.0 }
 0x1e1   : > { %vm926_vm1 = vcmask 7168   ;;  %vm958_vm11 = vcmp.eq.s32.totalorder %v1341_v21, 0  ;;  %vm983_vm0 = vcmask (!%p1169_p5), 1041408   ;;  %vm1048_vm13 = vcmask (!%p1169_p5), 1040384  }
 0x1e2   : > { %v307_v20 = vpop.xlane.xlu1 %306  ;;  %v304_v17 = vpop.xlane.xlu0 %303  ;;  %vm1062_vm15 = vcmp.eq.s32.totalorder (!%p1169_p5), %v1389_v44, 6 }
 0x1e3   : > { %784 = vperm.xlu1 %1217, %v755_v25   ;;  %1246 = vlog2.f32 %v304_v17 }
 0x1e4   : > { %1248 = vlog2.f32 %v307_v20 }
 0x1e5   : > { %v1235_v0 = vpop.eup %1234 }
 0x1e6   : > { %v419_v19 = vpop.xlane.xlu1 %418  ;;  %v416_v1 = vpop.xlane.xlu0 %415  ;;  %v311_v14 = vmul.f32 0.6931472, %v1235_v0 }
 0x1e7   : > { %787 = vperm.xlu1 %1217, %v756_v15   ;;  %v1237_v24 = vpop.eup %1236 }
 0x1e8   : > { %v1239_v33 = vpop.eup %1238  ;;  %v309_v18 = vmul.f32 0.6931472, %v1237_v24  ;;  %v439_v37 = vsub.f32 %v311_v14, %v419_v19 }
 0x1e9   : > { %v1241_v2 = vpop.eup %1240  ;;  %v313_v29 = vmul.f32 0.6931472, %v1239_v33 }
 0x1ea   : > { %v422_v30 = vpop.xlane.xlu0 %421  ;;  %v425_v48 = vpop.xlane.xlu1 %424  ;;  %v438_v27 = vsub.f32 %v309_v18, %v416_v1  ;;  %v315_v31 = vmul.f32 0.6931472, %v1241_v2  ;;  %v462_v39 = vrot.slane %v439_v37, %v1679_v34 }
 0x1eb   : > { %v1243_v5 = vpop.eup %1242  ;;  %v440_v45 = vsub.f32 %v313_v29, %v422_v30 }
 0x1ec   : > { %v1245_v50 = vpop.eup %1244  ;;  %v317_v35 = vmul.f32 0.6931472, %v1243_v5  ;;  %v458_v40 = vrot.slane %v438_v27, %v1679_v34  ;;  %v441_v11 = vsub.f32 %v315_v31, %v425_v48 }
 0x1ed   : > { %v1247_v60 = vpop.eup %1246  ;;  %v466_v58 = vrot.slane %v440_v45, %v1679_v34  ;;  %v319_v57 = vmul.f32 0.6931472, %v1245_v50 }
 0x1ee   : > { %922 = vadd.xlane.f32.xlu0 %v921_v62  ;;  %v428_v41 = vpop.xlane.xlu0 %427  ;;  %v431_v36 = vpop.xlane.xlu1 %430  ;;  %v321_v59 = vmul.f32 0.6931472, %v1247_v60  ;;  %v488_v56 = vsel %vm487_vm4, %v462_v39, %v458_v40  ;;  %v470_v10 = vrot.slane %v441_v11, %v1679_v34 }
 0x1ef   : > { %v442_v42 = vsub.f32 %v317_v35, %v428_v41  ;;  %v1249_v8 = vpop.eup %1248  ;;  %v443_v53 = vsub.f32 %v319_v57, %v431_v36  ;;  %v490_v43 = vsel %vm489_vm5, %v466_v58, %v488_v56 }
 0x1f0   : > { %v323_v55 = vmul.f32 0.6931472, %v1249_v8  ;;  %v492_v63 = vsel %vm491_vm9, %v470_v10, %v490_v43 }
 0x1f1   : > { %v474_v16 = vrot.slane %v442_v42, %v1679_v34  ;;  %v478_v49 = vrot.slane %v443_v53, %v1679_v34 }
 0x1f2   : > { %v434_v12 = vpop.xlane.xlu0 %433  ;;  %v437_v6 = vpop.xlane.xlu1 %436 }
 0x1f3   : > { %v444_v13 = vsub.f32 %v321_v59, %v434_v12  ;;  %v445_v61 = vsub.f32 %v323_v55, %v437_v6  ;;  %v494_v9 = vsel %vm493_vm10, %v474_v16, %v492_v63 }
 0x1f4   : > { %v496_v54 = vsel %vm495_vm14, %v478_v49, %v494_v9 }
 0x1f5   : > { %v482_v28 = vrot.slane %v444_v13, %v1679_v34  ;;  %v486_v47 = vrot.slane %v445_v61, %v1679_v34 }
 0x1f6   : > { %v841_v17 = vpop.xlane.xlu1 %840 }
 0x1f7   : > { %v498_v46 = vsel %vm497_vm3, %v482_v28, %v496_v54  ;;  %v842_v13 = vrot.slane %v841_v17, 4 }
 0x1f8   : > { %v500_v32 = vsel %vm499_vm6, %v486_v47, %v498_v46 }
 0x1f9   : > { %v502_v25 = vmul.f32 %v500_v32, %v446_v22  ;;  %v843_v55 = vadd.f32 %v842_v13, %v841_v17 }
 0x1fb   : > { %v504_v20 = vsel %vm503_vm12, %v502_v25, 0.0  ;;  %v844_v63 = vrot.slane %v843_v55, 2 }
 0x1fd   : > { %v845_v52 = vadd.f32 %v844_v63, %v843_v55 }
 0x1ff   : > { %v846_v51 = vrot.slane %v845_v52, 1 }
 0x204   : > { %781 = vperm.xlu0 %1216, %v754_v3  }
 0x20b   : > { %505 = vadd.xlane.f32.xlu1 %v504_v20 }
 0x223   : > { %515 = vadd.xlane.f32.xlu0 %v514_v38  ;;  %v847_v38 = vadd.f32 %v846_v51, %v845_v52 }
 0x24e   : > { %v767_v1 = vpop.permute.xlu0 %766 }
 0x24f   : > { %v792_v62 = vrot.slane %v767_v1, %v1679_v34 }
 0x252   : > { %v770_v4 = vpop.permute.xlu1 %769 }
 0x253   : > { %v796_v24 = vrot.slane %v770_v4, %v1679_v34 }
 0x255   : > { %v821_v48 = vsel %vm487_vm4, %v796_v24, %v792_v62  ;;  %vm939_vm4 = vcmp.eq.s32.totalorder %v1389_v44, 0 }
 0x256   : > { %v773_v7 = vpop.permute.xlu1 %772 }
 0x257   : > { %v800_v23 = vrot.slane %v773_v7, %v1679_v34 }
 0x259   : > { %v822_v18 = vsel %vm489_vm5, %v800_v23, %v821_v48  ;;  %vm946_vm5 = vcmp.eq.s32.totalorder %v1389_v44, 2 }
 0x25a   : > { %v776_v15 = vpop.permute.xlu1 %775 }
 0x25b   : > { %v804_v33 = vrot.slane %v776_v15, %v1679_v34 }
 0x25d   : > { %v823_v5 = vsel %vm491_vm9, %v804_v33, %v822_v18  ;;  %vm950_vm9 = vcmp.eq.s32.totalorder %v1389_v44, 3 }
 0x25e   : > { %v779_v19 = vpop.permute.xlu1 %778 }
 0x25f   : > { %v808_v14 = vrot.slane %v779_v19, %v1679_v34 }
 0x261   : > { %v824_v27 = vsel %vm493_vm10, %v808_v14, %v823_v5  ;;  %vm954_vm10 = vcmp.eq.s32.totalorder %v1389_v44, 4  ;;  %v966_v5 = vld [vmem:[%s1809_s2] sm:$0xff] (!%p1169_p5) }
 0x262   : > { %v785_v0 = vpop.permute.xlu1 %784 }
 0x263   : > { %v816_v41 = vrot.slane %v785_v0, %v1679_v34 }
 0x266   : > { %v788_v2 = vpop.permute.xlu1 %787 }
 0x267   : > { %v820_v31 = vrot.slane %v788_v2, %v1679_v34 }
 0x27b   : > { %v923_v30 = vpop.xlane.xlu0 %922 }
 0x27c   : > { %v924_v45 = vsub.f32 %v923_v30, %v841_v17 }
 0x27e   : > { %v925_v60 = vand.u32 2147483647, %v924_v45 }
 0x280   : > { %v927_v40 = vsel %vm926_vm1, %v925_v60, 0.0 }
 0x283   : > { %v782_v29 = vpop.permute.xlu0 %781 }
 0x284   : > { %v812_v37 = vrot.slane %v782_v29, %v1679_v34 }
 0x286   : > { %v825_v50 = vsel %vm495_vm14, %v812_v37, %v824_v27  ;;  %v968_v37 = vrot.slane (!%p1169_p5), %v966_v5, 2  ;;  %v994_v27 = vmul.f32 (!%p1169_p5), 0.5, %v966_v5  ;;  %vm1059_vm14 = vcmp.eq.s32.totalorder (!%p1169_p5), %v1389_v44, 5 }
 0x287   : > { %v826_v36 = vsel %vm497_vm3, %v816_v41, %v825_v50  ;;  %v1000_v50 = vrot.slane (!%p1169_p5), %v966_v5, 1 }
 0x288   : > { %v827_v35 = vsel %vm499_vm6, %v820_v31, %v826_v36  ;;  %v970_v41 = vsub.f32 (!%p1169_p5), %v966_v5, %v968_v37  ;;  %v996_v45 = vrot.slane (!%p1169_p5), %v994_v27, 4  ;;  %v965_v31 = vld [vmem:[%s1810_s3] sm:$0x1] (!%p1169_p5) }
 0x289   : > { %v829_v39 = vsel %vm503_vm12, %v827_v35, 0.0  ;;  %vm942_vm12 = vcmp.eq.s32.totalorder %v1389_v44, 1 }
 0x28a   : > { %830 = vadd.xlane.f32.xlu1 %v829_v39  ;;  %v971_v36 = vand.u32 (!%p1169_p5), 2147483647, %v970_v41  ;;  %v998_v35 = vsub.f32 (!%p1169_p5), %v966_v5, %v996_v45  ;;  %v999_v60 = vadd.f32 (!%p1169_p5), %v996_v45, %v966_v5 }
 0x28c   : > { %v973_v39 = vrot.slane (!%p1169_p5), %v971_v36, 4 }
 0x28e   : > { %928 = vadd.xlane.f32.xlu1 %v927_v40  ;;  %v980_v40 = vrot.slane (!%p1169_p5), %v965_v31, %v1354_v26 }
 0x298   : > { %v506_v11 = vpop.xlane.xlu1 %505 }
 0x299   : > { %v507_v58 = vrot.slane %v506_v11, 4 }
 0x29b   : > { %v508_v42 = vadd.f32 %v507_v58, %v506_v11  ;;  %v1004_v11 = vrot.slane (!%p1169_p5), %v999_v60, 2  ;;  %v1008_v58 = vrot.slane (!%p1169_p5), %v998_v35, 2 }
 0x29d   : > { %v509_v57 = vrot.slane %v508_v42, 2 }
 0x29f   : > { %v510_v12 = vadd.f32 %v509_v57, %v508_v42  ;;  %v1002_v42 = vmul.f32 (!%p1169_p5), %v1000_v50, %v966_v5  ;;  %v975_v57 = vadd.f32 (!%p1169_p5), %v973_v39, %v971_v36 }
 0x2a1   : > { %v511_v8 = vrot.slane %v510_v12, 1 }
 0x2a3   : > { %v512_v34 = vadd.f32 %v511_v8, %v510_v12  ;;  %v1006_v12 = vmin.f32 (!%p1169_p5), %v999_v60, %v1004_v11  ;;  %v1010_v8 = vmax.f32 (!%p1169_p5), %v998_v35, %v1008_v58 }
 0x2a5   : > { %1191 = vpush %v512_v34  ;;  %v1031_v34 = vmax.f32 (!%p1169_p5), %v999_v60, %v1004_v11 }
 0x2b0   : > { %v516_v59 = vpop.xlane.xlu0 %515 }
 0x2b1   : > { %v517_v56 = vrot.slane %v516_v59, 4 }
 0x2b3   : > { %v518_v10 = vadd.f32 %v517_v56, %v516_v59  ;;  %v1032_v59 = vmin.f32 (!%p1169_p5), %v998_v35, %v1008_v58  ;;  %v982_v56 = vmul.f32 (!%p1169_p5), %v980_v40, %v975_v57 }
 0x2b5   : > { %v519_v53 = vrot.slane %v518_v10, 2 }
 0x2b7   : > { %v520_v43 = vadd.f32 %v519_v53, %v518_v10  ;;  %v1011_v10 = vsub.f32 (!%p1169_p5), %v1006_v12, %v1010_v8  ;;  %v1033_v53 = vsub.f32 (!%p1169_p5), %v1031_v34, %v1032_v59 }
 0x2b9   : > { %v521_v16 = vrot.slane %v520_v43, 1  ;;  %v1035_v13 = vrot.slane (!%p1169_p5), %v1033_v53, 1 }
 0x2bb   : > { %v522_v6 = vadd.f32 %v521_v16, %v520_v43  ;;  %v984_v43 = vsel (!%p1169_p5), %vm983_vm0, %v982_v56, 0.0  ;;  %v1012_v16 = vmax.f32 (!%p1169_p5), %v1011_v10, 0.0 }
 0x2bc   : > { %985 = vadd.xlane.f32.xlu0 (!%p1169_p5), %v984_v43 }
 0x2bd   : > { %1193 = vpush %v522_v6  ;;  %v1018_v6 = vrot.slane (!%p1169_p5), %v1002_v42, 2  ;;  %v1014_v55 = vrot.slane (!%p1169_p5), %v1012_v16, 1 }
 0x2bf   : > { %v1016_v26 = vmul.f32 (!%p1169_p5), %v1014_v55, %v1012_v16  ;;  %v1020_v63 = vadd.f32 (!%p1169_p5), %v1018_v6, %v1002_v42 }
 0x2d6   : > { %s1192_s27 = spop %1191 }
 0x2d7   : > { %v940_v15 = vstv %s1192_s27 }
 0x2d8   : > { %v941_v1 = vsel %vm939_vm4, %v940_v15, 0.0 }
 0x2ee   : > { %s1194_s28 = spop %1193 }
 0x2ef   : > { %v943_v7 = vstv %s1194_s28 }
 0x2f0   : > { %v944_v19 = vsel %vm942_vm12, %v943_v7, 0.0 }
 0x2f1   : > { %v945_v0 = vadd.f32 %v944_v19, %v941_v1 }
 0x317   : > { %v831_v49 = vpop.xlane.xlu1 %830 }
 0x318   : > { %v832_v61 = vrot.slane %v831_v49, 4 }
 0x31a   : > { %v833_v9 = vadd.f32 %v832_v61, %v831_v49  ;;  %v1037_v49 = vmul.f32 (!%p1169_p5), %v1035_v13, %v1033_v53  ;;  %v1022_v61 = vrot.slane (!%p1169_p5), %v1016_v26, 4 }
 0x31b   : > { %v929_v28 = vpop.xlane.xlu1 %928 }
 0x31c   : > { %v834_v47 = vrot.slane %v833_v9, 2  ;;  %v930_v3 = vrot.slane %v929_v28, 4 }
 0x31e   : > { %v931_v54 = vadd.f32 %v930_v3, %v929_v28  ;;  %v835_v46 = vadd.f32 %v834_v47, %v833_v9  ;;  %v1038_v9 = vmax.f32 (!%p1169_p5), %v1037_v49, 1e-06  ;;  %v1024_v28 = vsub.f32 (!%p1169_p5), %v1020_v63, %v1022_v61 }
 0x320   : > { %v932_v22 = vrot.slane %v931_v54, 2  ;;  %v836_v32 = vrot.slane %v835_v46, 1  ;;  %v1025_v52 = vmax.f32 (!%p1169_p5), %v1024_v28, 1e-06  ;;  %1250 = vrcp.f32 (!%p1169_p5), %v1038_v9 }
 0x321   : > { %v1040_v3 = vrot.slane (!%p1169_p5), %v1024_v28, 4 }
 0x322   : > { %v933_v25 = vadd.f32 %v932_v22, %v931_v54  ;;  %v837_v20 = vadd.f32 %v836_v32, %v835_v46  ;;  %v1027_v47 = vrot.slane (!%p1169_p5), %v1025_v52, 4 }
 0x323   : > { %v1042_v54 = vsub.f32 (!%p1169_p5), %v1038_v9, %v1040_v3 }
 0x324   : > { %1195 = vpush %v837_v20  ;;  %v934_v4 = vrot.slane %v933_v25, 1  ;;  %1252 = vrcp.f32 (!%p1169_p5), %v1027_v47 }
 0x325   : > { %1197 = vpush %v847_v38 }
 0x326   : > { %v935_v17 = vadd.f32 %v934_v4, %v933_v25 }
 0x328   : > { %1199 = vpush %v935_v17 }
 0x32a   : > { %v1251_v46 = vpop.eup (!%p1169_p5), %1250 }
 0x32b   : > { %v1044_v51 = vmul.f32 (!%p1169_p5), %v1251_v46, %v1042_v54 }
 0x32e   : > { %v1253_v22 = vpop.eup (!%p1169_p5), %1252 }
 0x32f   : > { %v1030_v32 = vmul.f32 (!%p1169_p5), %v1253_v22, %v1016_v26 }
 0x331   : > { %v1045_v25 = vsub.f32 (!%p1169_p5), %v1030_v32, %v1044_v51 }
 0x333   : > { %v1046_v20 = vsub.f32 (!%p1169_p5), 1.0, %v1045_v25 }
 0x335   : > { %v1047_v38 = vmul.f32 (!%p1169_p5), %v1046_v20, %v965_v31 }
 0x337   : > { %v1049_v4 = vsel (!%p1169_p5), %vm1048_vm13, %v1047_v38, 0.0 }
 0x338   : > { %1050 = vadd.xlane.f32.xlu0 (!%p1169_p5), %v1049_v4 }
 0x349   : > { %v986_v17 = vpop.xlane.xlu0 (!%p1169_p5), %985 }
 0x34a   : > { %v987_v7 = vrot.slane (!%p1169_p5), %v986_v17, 4 }
 0x34c   : > { %v988_v15 = vadd.f32 (!%p1169_p5), %v987_v7, %v986_v17 }
 0x34e   : > { %v989_v19 = vrot.slane (!%p1169_p5), %v988_v15, 2 }
 0x350   : > { %v990_v1 = vadd.f32 (!%p1169_p5), %v989_v19, %v988_v15 }
 0x355   : > { %s1196_s29 = spop %1195 }
 0x356   : > { %v947_v24 = vstv %s1196_s29  ;;  %s1198_s30 = spop %1197 }
 0x357   : > { %v948_v23 = vsel %vm946_vm5, %v947_v24, 0.0  ;;  %v951_v30 = vstv %s1198_s30 }
 0x358   : > { %v949_v62 = vadd.f32 %v948_v23, %v945_v0  ;;  %v952_v33 = vsel %vm950_vm9, %v951_v30, 0.0  ;;  %v991_v0 = vrot.slane (!%p1169_p5), %v990_v1, 1 }
 0x359   : > { %s1200_s5 = spop %1199  ;;  %964 = sbr.rel (%p1169_p5) target bundleno = 1036 (0x40c), region = 40 }
 0x35a   : > { %v953_v14 = vadd.f32 %v952_v33, %v949_v62  ;;  %v955_v48 = vstv %s1200_s5  ;;  %v992_v24 = vadd.f32 (!%p1169_p5), %v991_v0, %v990_v1 }
 0x35b   : > { %v956_v18 = vsel %vm954_vm10, %v955_v48, 0.0 }
 0x35c   : > { %v957_v2 = vadd.f32 %v956_v18, %v953_v14  ;;  %1201 = vpush (!%p1169_p5), %v992_v24 }
 0x35e   : > { %v959_v29 = vsel %vm958_vm11, %v957_v2, 0.0 }
 0x35f   : > { %960 = vst [vmem:[%s1785_s8] sm:$0xff] %v959_v29 }
 0x366   : > { %v1066_v41 = vld [vmem:[%s1785_s8] sm:$0xff] }
 0x38d   : > { %s1202_s13 = spop %1201 }
 0x38e   : > { %v1060_v2 = vstv %s1202_s13 }
 0x38f   : > { %v1061_v5 = vsel %vm1059_vm14, %v1060_v2, 0.0 }
 0x3c5   : > { %v1051_v23 = vpop.xlane.xlu0 %1050 }
 0x3c6   : > { %v1052_v30 = vrot.slane %v1051_v23, 4 }
 0x3c8   : > { %v1053_v62 = vadd.f32 %v1052_v30, %v1051_v23 }
 0x3ca   : > { %v1054_v33 = vrot.slane %v1053_v62, 2 }
 0x3cc   : > { %v1055_v14 = vadd.f32 %v1054_v33, %v1053_v62 }
 0x3ce   : > { %v1056_v48 = vrot.slane %v1055_v14, 1 }
 0x3d0   : > { %v1057_v18 = vadd.f32 %v1056_v48, %v1055_v14 }
 0x3d2   : > { %1203 = vpush %v1057_v18 }
 0x403   : > { %s1204_s14 = spop %1203 }
 0x404   : > { %v1063_v29 = vstv %s1204_s14 }
 0x405   : > { %v1064_v37 = vsel %vm1062_vm15, %v1063_v29, 0.0 }
 0x406   : > { %v1065_v27 = vadd.f32 %v1064_v37, %v1061_v5 }
 0x408   : > { %v1067_v45 = vsel %vm958_vm11, %v1065_v27, 0.0 }
 0x409   : > { %v1068_v31 = vadd.f32 %v1067_v45, %v1066_v41 }
 0x40b   : > { %1069 = vst [vmem:[%s1785_s8] sm:$0xff] %v1068_v31 }
 0x40c PF: > { %s14_s15 = sadd.s32 1, %s1260_s15  }
 0x40d   : > { %p11_p6 = scmp.ge.s32.totalorder %s14_s15, 4  }
 0x40f   :  { %13 = sbr.rel (!%p11_p6) target bundleno = 1 (0x1), region = 73 }

</bundles_post_ra>
